<compile_context>
chip_gen: v5e
topology: v5e:2x2
jax: 0.10.0
libtpu: 0.0.40
codegen_flags: <defaults>
</compile_context>

<pallas_src>
import jax
import jax.numpy as jnp
from jax.experimental import pallas as pl
from jax.experimental.pallas import tpu as pltpu


# ------------------------------------------------------------------ fused kernel
def _scse_fused_kernel(x_ref, w1t_ref, w2t_ref, ws_ref, bs_ref, o_ref):
    """One batch element per grid step: x_ref is the full (1, C, HW) slab (HW lane-dense)."""
    x = x_ref[0]                                                     # (C, HW), input dtype
    xf = x.astype(jnp.float32)

    # Channel squeeze-excite: GAP -> 1x1 conv -> relu -> 1x1 conv -> sigmoid.
    gap = jnp.mean(xf, axis=1, keepdims=True)                        # (C, 1)
    h = jnp.maximum(
        jnp.dot(w1t_ref[...], gap, preferred_element_type=jnp.float32), 0.0)   # (Cr, 1)
    s = jax.nn.sigmoid(
        jnp.dot(w2t_ref[...], h, preferred_element_type=jnp.float32))          # (C, 1)

    # Spatial squeeze-excite: 1x1 conv C->1 (+bias) -> sigmoid; small MXU matmul.
    t = jnp.dot(ws_ref[...], xf, preferred_element_type=jnp.float32)           # (1, HW)
    t = jax.nn.sigmoid(t + bs_ref[0])

    # out = x * sse + x * cse  (matches the reference op order).
    o_ref[0] = (xf * t + xf * s).astype(o_ref.dtype)


# ------------------------------------------------------------------ tiled apply kernel
def _scse_apply_kernel(x_ref, s_ref, ws_ref, bs_ref, o_ref):
    """x_ref: (1, C, T) HW-tile; channel gate s precomputed (wrapper) since GAP is global."""
    xf = x_ref[0].astype(jnp.float32)                                # (C, T)
    s = s_ref[0]                                                     # (C, 1) channel gate

    t = jnp.dot(ws_ref[...], xf, preferred_element_type=jnp.float32) # (1, T)
    t = jax.nn.sigmoid(t + bs_ref[0])

    o_ref[0] = (xf * t + xf * s).astype(o_ref.dtype)


def _pick_hw_tile(hw, c, esize, max_block_bytes):
    """Lane-dense HW tile (128-multiple or full extent) whose (C, tile) block fits the budget."""
    cap = max(128, (max_block_bytes // (esize * c)) // 128 * 128)
    if hw <= cap:
        return hw                                   # full extent is always a legal block dim
    # Prefer a 128-multiple divisor of HW (no ragged edge); otherwise accept a ragged
    # last block -- pl.cdiv sizes the grid and Pallas masks the edge stores.
    cand, tries = cap, 0
    while cand >= 128 and tries < 64:
        if hw % cand == 0:
            return cand
        cand -= 128
        tries += 1
    return cap


def scse_block(x_nchw, w1, w2, ws, bs, *,
               max_block_bytes=6 * 1024 * 1024,
               vmem_limit_bytes=32 * 1024 * 1024):
    """SCSE forward.

    x_nchw: (B, C, H, W). w1: (C, Cr), w2: (Cr, C) cSE 1x1 convs (bias=False).
    ws: (C, 1), bs: (1,) sSE 1x1 conv + bias. Returns (B, C, H, W) in x's dtype.
    Defaults keep 4 double-buffered blocks under ~24 MiB: safe at the 32 MiB scoped
    VMEM on v6e/v7x and well under v7x's 64 MiB physical cap (raise both on v6e).
    """
    B, C, H, W = x_nchw.shape
    HW = H * W
    dtype = x_nchw.dtype
    esize = jnp.dtype(dtype).itemsize
    Cr = w1.shape[1]

    x = x_nchw.reshape(B, C, HW)                       # NCHW -> (B, C, HW): pure reshape
    ws_row = ws.reshape(1, C).astype(jnp.float32)      # sSE weight as a row vector
    bs1 = bs.reshape(1).astype(jnp.float32)            # sSE bias -> SMEM scalar

    cost = pl.CostEstimate(
        flops=int(6 * B * HW * C),
        transcendentals=int(B * (HW + 2 * C)),
        bytes_accessed=int(2 * B * C * HW * esize + 2 * C * Cr * 4 + C * 4 + 4),
    )

    slab_bytes = C * HW * esize
    # Fused single-pass variant needs the whole per-batch slab in VMEM (GAP is global),
    # and B >= 2 so the "parallel" batch grid can feed both v7x TensorCores.
    use_fused = (slab_bytes <= max_block_bytes) and (B >= 2)

    if use_fused:
        out = pl.pallas_call(
            _scse_fused_kernel,
            out_shape=jax.ShapeDtypeStruct((B, C, HW), dtype),
            grid_spec=pltpu.PrefetchScalarGridSpec(
                num_scalar_prefetch=0,
                grid=(B,),
                in_specs=[
                    pl.BlockSpec((1, C, HW), lambda b: (b, 0, 0)),          # full batch slab
                    pl.BlockSpec((Cr, C), lambda b: (0, 0)),                # cSE conv1 (transposed)
                    pl.BlockSpec((C, Cr), lambda b: (0, 0)),                # cSE conv2 (transposed)
                    pl.BlockSpec((1, C), lambda b: (0, 0)),                 # sSE weight row
                    pl.BlockSpec(memory_space=pltpu.MemorySpace.SMEM),      # sSE bias scalar
                ],
                out_specs=pl.BlockSpec((1, C, HW), lambda b: (b, 0, 0)),
            ),
            compiler_params=pltpu.CompilerParams(
                dimension_semantics=("parallel",),
                vmem_limit_bytes=vmem_limit_bytes),
            cost_estimate=cost,
        )(x, w1.T, w2.T, ws_row, bs1)
        return out.reshape(B, C, H, W)

    # ---------- fallback: channel gate in the wrapper (one extra HBM read of x), tiled apply
    xf32 = x.astype(jnp.float32)
    gap = jnp.mean(xf32, axis=2)                                            # (B, C)
    h = jnp.maximum(jnp.dot(gap, w1.astype(jnp.float32)), 0.0)              # (B, Cr)
    s = jax.nn.sigmoid(jnp.dot(h, w2.astype(jnp.float32))).reshape(B, C, 1)

    tile = _pick_hw_tile(HW, C, esize, max_block_bytes)
    n_tiles = pl.cdiv(HW, tile)

    out = pl.pallas_call(
        _scse_apply_kernel,
        out_shape=jax.ShapeDtypeStruct((B, C, HW), dtype),
        grid_spec=pltpu.PrefetchScalarGridSpec(
            num_scalar_prefetch=0,
            grid=(B, n_tiles),
            in_specs=[
                pl.BlockSpec((1, C, tile), lambda b, t: (b, 0, t)),         # x HW-tile (lane-dense)
                pl.BlockSpec((1, C, 1), lambda b, t: (b, 0, 0)),            # channel gate
                pl.BlockSpec((1, C), lambda b, t: (0, 0)),                  # sSE weight row
                pl.BlockSpec(memory_space=pltpu.MemorySpace.SMEM),          # sSE bias scalar
            ],
            out_specs=pl.BlockSpec((1, C, tile), lambda b, t: (b, 0, t)),
        ),
        compiler_params=pltpu.CompilerParams(
            dimension_semantics=("parallel", "parallel"),
            vmem_limit_bytes=vmem_limit_bytes),
        cost_estimate=cost,
    )(x, s, ws_row, bs1)
    return out.reshape(B, C, H, W)


def _reference(x, w1, w2, ws, bs):
    """Pure-JAX reference mirroring the PyTorch forward (NCHW)."""
    xf = x.astype(jnp.float32)
    gap = jnp.mean(xf, axis=(2, 3))                                         # (B, C)
    h = jnp.maximum(jnp.dot(gap, w1), 0.0)
    s = jax.nn.sigmoid(jnp.dot(h, w2))                                      # (B, C)
    cse = xf * s[:, :, None, None]
    t = jnp.einsum("bchw,c->bhw", xf, ws[:, 0]) + bs[0]
    sse = jax.nn.sigmoid(t)[:, None, :, :]
    return xf * sse + cse


if __name__ == "__main__":
    key = jax.random.PRNGKey(0)

    # ---- case 1: module spec shapes (batch=2, channels=4, 16x16, ratio=2) -> fused path ----
    B, C, H, W = 2, 4, 16, 16
    ratio = 2
    Cr = C // ratio

    kx, k1, k2, k3, k4 = jax.random.split(key, 5)
    x = jax.random.normal(kx, (B, C, H, W), dtype=jnp.float32)
    w1 = jax.random.normal(k1, (C, Cr), dtype=jnp.float32) * 0.5    # cSE conv1 (bias=False)
    w2 = jax.random.normal(k2, (Cr, C), dtype=jnp.float32) * 0.5    # cSE conv2 (bias=False)
    ws = jax.random.normal(k3, (C, 1), dtype=jnp.float32) * 0.5     # sSE conv (C -> 1)
    bs = jax.random.normal(k4, (1,), dtype=jnp.float32) * 0.1       # sSE conv bias

    out = jax.block_until_ready(scse_block(x, w1, w2, ws, bs))
    ref = _reference(x, w1, w2, ws, bs)
    assert out.shape == (B, C, H, W)
    assert jnp.allclose(out, ref, atol=1e-5, rtol=1e-5)

    # ---- case 2: force the tiled fallback with a ragged HW edge (HW=672, tiny block cap) ----
    B2, C2, H2, W2 = 2, 8, 24, 28
    Cr2 = C2 // ratio
    kx2, k12, k22, k32, k42 = jax.random.split(jax.random.PRNGKey(1), 5)
    x2 = jax.random.normal(kx2, (B2, C2, H2, W2), dtype=jnp.float32)
    w1b = jax.random.normal(k12, (C2, Cr2), dtype=jnp.float32) * 0.5
    w2b = jax.random.normal(k22, (Cr2, C2), dtype=jnp.float32) * 0.5
    wsb = jax.random.normal(k32, (C2, 1), dtype=jnp.float32) * 0.5
    bsb = jax.random.normal(k42, (1,), dtype=jnp.float32) * 0.1

    out2 = jax.block_until_ready(
        scse_block(x2, w1b, w2b, wsb, bsb, max_block_bytes=8192))   # slab > cap -> tiled, ragged edge
    ref2 = _reference(x2, w1b, w2b, wsb, bsb)
    assert jnp.allclose(out2, ref2, atol=1e-5, rtol=1e-5)

    print("KERNEL_OK")
</pallas_src>

<mosaic_0001>
module attributes {stable_mosaic.version = 11 : i64} {
  func.func @_scse_fused_kernel(%arg0: i32, %arg1: memref<1x4x256xf32, #tpu.memory_space<vmem>>, %arg2: memref<2x4xf32, #tpu.memory_space<vmem>>, %arg3: memref<4x2xf32, #tpu.memory_space<vmem>>, %arg4: memref<1x4xf32, #tpu.memory_space<vmem>>, %arg5: memref<1xf32, #tpu.memory_space<smem>>, %arg6: memref<1x4x256xf32, #tpu.memory_space<vmem>>) attributes {dimension_semantics = [#tpu.dimension_semantics<parallel>], iteration_bounds = array<i64: 2>, scalar_prefetch = 0 : i64, scratch_operands = 0 : i64, tpu.core_type = #tpu.core_type<tc>, window_params = [{transform_indices = @transform_0, window_bounds = array<i64: 1, 4, 256>}, {pipeline_mode = #tpu.pipeline_mode<synchronous>, transform_indices = @transform_1, window_bounds = array<i64: 2, 4>}, {pipeline_mode = #tpu.pipeline_mode<synchronous>, transform_indices = @transform_2, window_bounds = array<i64: 4, 2>}, {pipeline_mode = #tpu.pipeline_mode<synchronous>, transform_indices = @transform_3, window_bounds = array<i64: 1, 4>}, {transform_indices = @transform_4, window_bounds = array<i64: 1>}, {transform_indices = @transform_5, window_bounds = array<i64: 1, 4, 256>}]} {
    %c0 = arith.constant 0 : index
    %c0_0 = arith.constant 0 : index
    %c0_1 = arith.constant 0 : index
    %0 = vector.load %arg1[%c0, %c0_0, %c0_1] : memref<1x4x256xf32, #tpu.memory_space<vmem>>, vector<1x4x256xf32>
    %1 = vector.shape_cast %0 : vector<1x4x256xf32> to vector<4x256xf32>
    %cst = arith.constant dense<0.000000e+00> : vector<4xf32>
    %2 = vector.multi_reduction <add>, %1, %cst [1] : vector<4x256xf32> to vector<4xf32>
    %3 = vector.shape_cast %2 : vector<4xf32> to vector<4x1xf32>
    %cst_2 = arith.constant 2.560000e+02 : f32
    %4 = vector.broadcast %cst_2 : f32 to vector<4x1xf32>
    %5 = arith.divf %3, %4 : vector<4x1xf32>
    %c0_3 = arith.constant 0 : index
    %c0_4 = arith.constant 0 : index
    %6 = vector.load %arg2[%c0_3, %c0_4] : memref<2x4xf32, #tpu.memory_space<vmem>>, vector<2x4xf32>
    %cst_5 = arith.constant dense<0.000000e+00> : vector<2x1xf32>
    %7 = tpu.matmul %6, %5, %cst_5 {dimension_numbers = #tpu.dot_dimension_numbers<[1], [0], [0], [1], [0, 0, 1, 1], [], []>} : vector<2x4xf32>, vector<4x1xf32>, vector<2x1xf32> -> vector<2x1xf32>
    %cst_6 = arith.constant 0.000000e+00 : f32
    %8 = vector.broadcast %cst_6 : f32 to vector<2x1xf32>
    %9 = arith.maximumf %7, %8 : vector<2x1xf32>
    %c0_7 = arith.constant 0 : index
    %c0_8 = arith.constant 0 : index
    %10 = vector.load %arg3[%c0_7, %c0_8] : memref<4x2xf32, #tpu.memory_space<vmem>>, vector<4x2xf32>
    %cst_9 = arith.constant dense<0.000000e+00> : vector<4x1xf32>
    %11 = tpu.matmul %10, %9, %cst_9 {dimension_numbers = #tpu.dot_dimension_numbers<[1], [0], [0], [1], [0, 0, 1, 1], [], []>} : vector<4x2xf32>, vector<2x1xf32>, vector<4x1xf32> -> vector<4x1xf32>
    %12 = arith.negf %11 : vector<4x1xf32>
    %13 = math.exp %12 : vector<4x1xf32>
    %cst_10 = arith.constant 1.000000e+00 : f32
    %14 = vector.broadcast %cst_10 : f32 to vector<4x1xf32>
    %15 = arith.addf %14, %13 : vector<4x1xf32>
    %16 = arith.divf %14, %15 : vector<4x1xf32>
    %c0_11 = arith.constant 0 : index
    %c0_12 = arith.constant 0 : index
    %17 = vector.load %arg4[%c0_11, %c0_12] : memref<1x4xf32, #tpu.memory_space<vmem>>, vector<1x4xf32>
    %cst_13 = arith.constant dense<0.000000e+00> : vector<1x256xf32>
    %18 = tpu.matmul %17, %1, %cst_13 {dimension_numbers = #tpu.dot_dimension_numbers<[1], [0], [0], [1], [0, 0, 1, 1], [], []>} : vector<1x4xf32>, vector<4x256xf32>, vector<1x256xf32> -> vector<1x256xf32>
    %c0_14 = arith.constant 0 : index
    %19 = memref.load %arg5[%c0_14] : memref<1xf32, #tpu.memory_space<smem>>
    %20 = vector.broadcast %19 : f32 to vector<1x256xf32>
    %21 = arith.addf %18, %20 : vector<1x256xf32>
    %22 = arith.negf %21 : vector<1x256xf32>
    %23 = math.exp %22 : vector<1x256xf32>
    %cst_15 = arith.constant 1.000000e+00 : f32
    %24 = vector.broadcast %cst_15 : f32 to vector<1x256xf32>
    %25 = arith.addf %24, %23 : vector<1x256xf32>
    %26 = arith.divf %24, %25 : vector<1x256xf32>
    %27 = vector.broadcast %26 : vector<1x256xf32> to vector<4x256xf32>
    %28 = arith.mulf %1, %27 : vector<4x256xf32>
    %29 = vector.broadcast %16 : vector<4x1xf32> to vector<4x256xf32>
    %30 = arith.mulf %1, %29 : vector<4x256xf32>
    %31 = arith.addf %28, %30 : vector<4x256xf32>
    %c0_16 = arith.constant 0 : index
    %c0_17 = arith.constant 0 : index
    %c0_18 = arith.constant 0 : index
    %32 = vector.load %arg6[%c0_16, %c0_17, %c0_18] : memref<1x4x256xf32, #tpu.memory_space<vmem>>, vector<1x4x256xf32>
    %33 = vector.shape_cast %32 : vector<1x4x256xf32> to vector<4x256xf32>
    %34 = vector.shape_cast %31 : vector<4x256xf32> to vector<1x4x256xf32>
    tpu.vector_store %arg6[%c0_16, %c0_17, %c0_18], %34 {strides = array<i32>} : memref<1x4x256xf32, #tpu.memory_space<vmem>>, vector<1x4x256xf32>,
    return
  }
  func.func @transform_0(%arg0: i32) -> (i32, i32, i32) {
    %c0_i32 = arith.constant 0 : i32
    %c0_i32_0 = arith.constant 0 : i32
    %c0_i32_1 = arith.constant 0 : i32
    return %arg0, %c0_i32, %c0_i32_0 : i32, i32, i32
  }
  func.func @transform_1(%arg0: i32) -> (i32, i32) {
    %c0_i32 = arith.constant 0 : i32
    %c0_i32_0 = arith.constant 0 : i32
    %c0_i32_1 = arith.constant 0 : i32
    return %c0_i32, %c0_i32_0 : i32, i32
  }
  func.func @transform_2(%arg0: i32) -> (i32, i32) {
    %c0_i32 = arith.constant 0 : i32
    %c0_i32_0 = arith.constant 0 : i32
    %c0_i32_1 = arith.constant 0 : i32
    return %c0_i32, %c0_i32_0 : i32, i32
  }
  func.func @transform_3(%arg0: i32) -> (i32, i32) {
    %c0_i32 = arith.constant 0 : i32
    %c0_i32_0 = arith.constant 0 : i32
    %c0_i32_1 = arith.constant 0 : i32
    return %c0_i32, %c0_i32_0 : i32, i32
  }
  func.func @transform_4(%arg0: i32) -> i32 {
    %c0_i32 = arith.constant 0 : i32
    %c0_i32_0 = arith.constant 0 : i32
    return %c0_i32 : i32
  }
  func.func @transform_5(%arg0: i32) -> (i32, i32, i32) {
    %c0_i32 = arith.constant 0 : i32
    %c0_i32_0 = arith.constant 0 : i32
    %c0_i32_1 = arith.constant 0 : i32
    return %arg0, %c0_i32, %c0_i32_0 : i32, i32, i32
  }
}

</mosaic_0001>

<bundles_post_ra>
// kernel: tpu_custom_call.1
= control target key start
LH: loop header
LB: loop body
LE: loop exit
PB: predicated region body
PF: predicated region fallthrough
CT: control target
= control target key end

     0   :  { %s917_s0 = inlined_call_operand.hbm [shape: f32[2,4,256], index: 0, kind: input, shape index: {}]   ;;  %s918_s1 = inlined_call_operand.vmem [shape: f32[2,4], index: 1, kind: input, shape index: {}]   ;;  %s919_s2 = inlined_call_operand.vmem [shape: f32[4,2], index: 2, kind: input, shape index: {}]   ;;  %s920_s3 = inlined_call_operand.vmem [shape: f32[1,4], index: 3, kind: input, shape index: {}]   ;;  %s921_s4 = inlined_call_operand.<no memory space> [shape: f32[1], index: 4, kind: input, shape index: {}]   ;;  %s922_s5 = inlined_call_operand.hbm [shape: f32[2,4,256], index: 5, kind: output, shape index: {}]  }
   0x1   :  { %10 = sst [smem:[#allocation2]] %s921_s4 }
   0x2   :  { %11 = vsyncpa [#allocation4], 0 }
   0x3   :  { %13 = vsyncpa [#allocation4 + $0x1], 0 }
   0x4   :  { %14 = vsyncpa [#allocation5], 0 }
   0x5   :  { %16 = vsyncpa [#allocation5 + $0x1], 0  ;;  %s765_s20 = smov 0   ;;  %s767_s21 = smov 0  }
   0x6   :  { %s769_s22 = smov 0   ;;  %s771_s23 = smov 0  }
   0x7 LB: > { %s786_s4 = sadd.s32 4294967295, %s727_s23   ;;  %s540_s24 = sadd.s32 4294967294, %s727_s23   ;;  %s727_s23 = sphi %s771_s23, %s932_s23   ;;  %s723_s22 = sphi %s769_s22, %s931_s22   ;;  %s719_s21 = sphi %s767_s21, %s930_s21   ;;  %s715_s20 = sphi %s765_s20, %s929_s20  }
   0x8   : > { %s790_s25 = sadd.s32 1, %s727_s23   ;;  %s29_s26 = sadd.s32 1, %s723_s22 }
   0x9   : > { %s26_s27 = ssub.s32 %s727_s23, %s790_s25  ;;  %p36_p0 = scmp.ne.s32.totalorder %s723_s22, %s719_s21 }
   0xa   : > { %p27_p1 = scmp.eq.s32.totalorder %s26_s27, 0  ;;  %p37_p2 = scmp.eq.s32.totalorder %s727_s23, 0 }
   0xb   : > { %p42_p3 = scmp.ne.s32.totalorder %s719_s21, %s715_s20  ;;  %p43_p4 = scmp.eq.s32.totalorder %s786_s4, 0 }
   0xc   : > { %s802_s28 = scalar_select %p27_p1, %s723_s22, %s29_s26  }
   0xd   : > { %p804_p5 = por %p37_p2, %p36_p0  ;;  %p808_p6 = por %p43_p4, %p42_p3 }
   0xe   : > { %p150_p7 = scmp.eq.s32.totalorder %s786_s4, 1  ;;  %p156_p8 = scmp.eq.s32.totalorder %s540_s24, 1 }
   0xf   : > { %p579_p10 = scmp.lt.s32.totalorder %s727_s23, 2  ;;  %s188_s8 = sand.u32 1, %s723_s22  }
  0x10   : > { %p815_p11 = por %p150_p7, %p36_p0  ;;  %p819_p12 = por %p156_p8, %p42_p3 }
  0x11   : > { %s565_s9 = sshll.u32 %s727_s23, 3  ;;  %s543_s10 = sshll.u32 %s188_s8, 3 }
  0x12   : > { %s197_s13 = scalar_lea.hbm %s917_s0, %s565_s9  ;;  %s192_s15 = scalar_lea.vmem [#allocation3], %s543_s10 }
  0x13   : > { %s199_s14 = sshll.u32 %s197_s13, 4  ;;  %s201_s16 = sshll.u32 %s192_s15, 4  ;;  %s200_s14 = int_to_ptr.hbm [resolvable:$true] %s199_s14  ;;  %s202_s16 = int_to_ptr.vmem [resolvable:$true] %s201_s16 }
  0x14   : > { %p830_p13 = pnand %p579_p10, %p804_p5  ;;  %p546_p0 = scmp.ge.s32.totalorder %s727_s23, 1 }
  0x15   : > { %p206_p1 = scmp.lt.s32.totalorder %s727_s23, 3  ;;  %s189_s18 = scalar_lea.sflag [#allocation4], %s188_s8 }
  0x16   : > { %s631_s19 = sshra.s32 %s200_s14, 4  ;;  %p635_p3 = pneg %p830_p13  ;;  %s632_s19 = int_to_ptr.hbm [resolvable:$true] %s631_s19 }
  0x17   : > { %s633_s24 = scalar_lea.hbm %s632_s19, 8  ;;  %s638_s29 = scalar_lea.hbm %s917_s0, 16 }
  0x18   : > { %p634_p2 = scmp.ne.s32.totalorder %s632_s19, %s633_s24  ;;  %p639_p5 = scmp.lt.s32.totalorder %s632_s19, %s917_s0 }
  0x19   : > { %p640_p8 = scmp.lt.s32.totalorder %s638_s29, %s633_s24 }
  0x1a   : > { %p636_p4 = pnand %p635_p3, %p634_p2 }
  0x1b   : > { %p641_p10 = por %p640_p8, %p639_p5 }
  0x1c   : > { %p637_p7 = pneg %p636_p4 }
  0x1e   : > { %p642_p9 = pnand %p641_p10, %p637_p7 }
  0x20   : > { %645 = shalt.err (!%p642_p9)
}
  0x21   : > { %574 = dma.hbm_to_vmem [thread:$0]  (!%p830_p13), %s200_s14, 128, %s202_s16, %s189_s18  }
  0x22   : > { %p207_p2 = pnand %p546_p0, %p206_p1 }
  0x23   : > { %s851_s8 = sand.u32 (!%p207_p2), 1, %s719_s21  }
  0x24   : > { %210 = sbr.rel (%p207_p2) target bundleno = 580 (0x244), region = 40  ;;  %s547_s11 = sshll.u32 (!%p207_p2), %s851_s8, 3 }
  0x25   : > { %s213_s12 = scalar_lea.sflag (!%p207_p2), [#allocation4], %s851_s8  ;;  %s216_s13 = scalar_lea.vmem (!%p207_p2), [#allocation3], %s547_s11 }
  0x29   : > { %706 = dma.done.wait (%p808_p6), %s213_s12, 128  }
  0x2a   : > { %708 = vsyncadd (%p808_p6), %s213_s12, 4294967168  ;;  %v861_v0 = vld [vmem:[%s216_s13] sm:$0xff]  ;;  %vm251_vm0 = vcmask 1043456   ;;  %v729_v6 = vmov 256.0   ;;  %v265_v15 = vld [vmem:[%s918_s1] sm:$0x3] }
  0x2b   : > { %246 = vst [vmem:[#allocation1] ss:$2 sm:$0xff] %v861_v0  ;;  %617 = vrcp.f32 %v729_v6  ;;  %vm266_vm2 = vcmask 31744   ;;  %v342_v17 = vld [vmem:[%s920_s3] sm:$0x1]  ;;  %vm299_vm3 = vcmask 1041408  }
  0x2c   : > { %v294_v21 = vld [vmem:[%s919_s2] sm:$0xf]  ;;  %vm295_vm4 = vcmask 15360   ;;  %v730_v22 = vmov 0   ;;  %s343_s19 = sld [smem:[#allocation2]]  ;;  %s566_s24 = sshll.u32 %s786_s4, 3 }
  0x2d   : > { %616 = vset.pattern.permute.xlu0 %v730_v22  ;;  %v731_v6 = vmov 839922192   ;;  %s465_s29 = scalar_lea.hbm %s922_s5, %s566_s24  ;;  %s243_s9 = scalar_lea.vmem [#allocation6], %s547_s11 }
  0x2e   : > { %s467_s10 = sshll.u32 %s243_s9, 4  ;;  %s469_s12 = sshll.u32 %s465_s29, 4  ;;  %s468_s10 = int_to_ptr.vmem [resolvable:$true] %s467_s10  ;;  %s470_s12 = int_to_ptr.hbm [resolvable:$true] %s469_s12 }
  0x2f   : > { %s454_s4 = scalar_lea.sflag [#allocation5], %s851_s8  ;;  %s675_s13 = sshra.s32 %s470_s12, 4  ;;  %s676_s13 = int_to_ptr.hbm [resolvable:$true] %s675_s13 }
  0x30   : > { %s677_s30 = scalar_lea.hbm %s676_s13, 8  ;;  %s681_s15 = scalar_lea.hbm %s922_s5, 16 }
  0x31   : > { %v618_v7 = vpop.eup %617  ;;  %p678_p6 = scmp.ne.s32.totalorder %s676_s13, %s677_s30  ;;  %p682_p0 = scmp.lt.s32.totalorder %s676_s13, %s922_s5 }
  0x32   : > { %v247_v1 = vld.sshfl [vmem:[#allocation1] sm:$0xff pattern:$0x75316420]  ;;  %v248_v2 = vld.sshfl [vmem:[#allocation1 + $0x8] sm:$0xff pattern:$0x75316420]  ;;  %vm262_vm1 = vweird.f32 %v618_v7  ;;  %v344_v37 = vstv %s343_s19  ;;  %p683_p1 = scmp.lt.s32.totalorder %s681_s15, %s677_s30 }
  0x33   : > { %v252_v3 = vsel %vm251_vm0, %v247_v1, 0.0  ;;  %v253_v4 = vsel %vm251_vm0, %v248_v2, 0.0  ;;  %345 = vst [vmem:[#allocation1] ss:$2 sm:$0xff] %v861_v0  ;;  %v258_v8 = vmul.f32 256.0, %v618_v7  ;;  %p679_p9 = pnand %p678_p6, %p815_p11 }
  0x34   : > { %v254_v5 = vadd.f32 %v253_v4, %v252_v3  ;;  %p684_p3 = por %p683_p1, %p682_p0 }
  0x35   : > { %v259_v9 = vsub.f32 1.0, %v258_v8  ;;  %p680_p13 = pneg %p679_p9 }
  0x36   : > { %255 = vadd.xlane.f32.xlu0 %v254_v5 }
  0x37   : > { %v260_v10 = vmul.f32 %v618_v7, %v259_v9  ;;  %p685_p4 = pnand %p684_p3, %p680_p13 }
  0x39   : > { %v261_v11 = vadd.f32 %v618_v7, %v260_v10 }
  0x3a   : > { %v347_v16 = vld.sshfl [vmem:[#allocation1 + $0x8] sm:$0xff pattern:$0x75316420]  ;;  %v346_v18 = vld.sshfl [vmem:[#allocation1] sm:$0xff pattern:$0x75316420] }
  0x3b   : > { %v263_v12 = vsel %vm262_vm1, %v618_v7, %v261_v11  ;;  %556 = vmatpush.msk.msra.mxu3 %vm251_vm0, %v347_v16  ;;  %554 = vmatpush.msk.msra.mxu2 %vm251_vm0, %v346_v18  ;;  %v446_v7 = vunpack.c.l.s4 %v731_v6 }
  0x3c   : > { %557 = vmatmul.msk.f32.vlgmr.msra.gmra.mxu3 %vm266_vm2, %v342_v17  ;;  %555 = vmatmul.msk.f32.vlgmr.msra.gmra.mxu2 %vm266_vm2, %v342_v17 }
  0x3d   : > { %v447_v10 = vunpack.c.0.s8 %v446_v7 }
  0xa9   : > { %v256_v13 = vpop.xlane.xlu0 %255 }
  0xaa   : > { %v264_v14 = vmul.f32 %v263_v12, %v256_v13 }
  0xac   : > { %549 = vmatpush.msk.msra.mxu0 %vm251_vm0, %v264_v14 }
  0xad   : > { %550 = vmatmul.msk.f32.vlgmr.msra.gmra.mxu0 %vm266_vm2, %v265_v15 }
  0xbf   : > { %v392_v38 = vpop.f32.mrf.mxu3  ;;  %v372_v40 = vpop.f32.mrf.mxu2 }
  0xc0   : > { %v393_v39 = vadd.f32 %v392_v38, %v344_v37  ;;  %v373_v42 = vadd.f32 %v372_v40, %v344_v37 }
  0xc2   : > { %v559_v41 = vmul.f32 -1.442695, %v393_v39  ;;  %v558_v43 = vmul.f32 -1.442695, %v373_v42 }
 0x12a   : > { %v290_v19 = vpop.f32.mrf.mxu0 }
 0x12b   : > { %v293_v20 = vmax.f32 %v290_v19, 0.0 }
 0x12d   : > { %551 = vmatpush.msk.msra.mxu1 %vm299_vm3, %v293_v20 }
 0x12e   : > { %552 = vmatmul.msk.f32.vlgmr.msra.gmra.mxu1 %vm295_vm4, %v294_v21 }
 0x1ab   : > { %v320_v23 = vpop.f32.mrf.mxu1 }
 0x1ac   : > { %v553_v24 = vmul.f32 -1.442695, %v320_v23 }
 0x1ae   : > { %619 = vpow2.f32 %v553_v24 }
 0x1b4   : > { %v620_v25 = vpop.eup %619 }
 0x1b5   : > { %v326_v26 = vadd.f32 1.0, %v620_v25 }
 0x1b7   : > { %621 = vrcp.f32 %v326_v26  ;;  %v338_v30 = vand.u32 2147483648, %v326_v26  ;;  %v336_v32 = vand.u32 2147483647, %v326_v26  ;;  %vm332_vm6 = vweird.f32 %v326_v26 }
 0x1b8   : > { %623 = vpow2.f32 %v559_v41 }
 0x1b9   : > { %v339_v34 = vor.u32 1.1754944e-38, %v338_v30  ;;  %vm337_vm8 = vcmp.eq.f32.partialorder %v336_v32, 8.507059e+37  ;;  %625 = vpow2.f32 %v558_v43 }
 0x1bd   : > { %v622_v27 = vpop.eup %621 }
 0x1be   : > { %v328_v28 = vmul.f32 %v622_v27, %v326_v26  ;;  %vm333_vm5 = vweird.f32 %v622_v27  ;;  %v624_v44 = vpop.eup %623 }
 0x1bf   : > { %vm334_vm7 = vmor %vm332_vm6, %vm333_vm5  ;;  %v402_v45 = vadd.f32 1.0, %v624_v44  ;;  %v626_v46 = vpop.eup %625 }
 0x1c0   : > { %v329_v29 = vsub.f32 1.0, %v328_v28  ;;  %v401_v47 = vadd.f32 1.0, %v626_v46 }
 0x1c1   : > { %627 = vrcp.f32 %v402_v45  ;;  %vm423_vm9 = vweird.f32 %v402_v45  ;;  %v429_v55 = vand.u32 2147483648, %v402_v45  ;;  %v427_v58 = vand.u32 2147483647, %v402_v45 }
 0x1c2   : > { %v330_v31 = vmul.f32 %v622_v27, %v329_v29  ;;  %629 = vrcp.f32 %v401_v47  ;;  %vm408_vm12 = vweird.f32 %v401_v47  ;;  %v414_v60 = vand.u32 2147483648, %v401_v47 }
 0x1c3   : > { %v430_v59 = vor.u32 1.1754944e-38, %v429_v55  ;;  %v412_v62 = vand.u32 2147483647, %v401_v47  ;;  %vm428_vm14 = vcmp.eq.f32.partialorder %v427_v58, 8.507059e+37 }
 0x1c4   : > { %v331_v33 = vadd.f32 %v622_v27, %v330_v31  ;;  %v415_v1 = vor.u32 1.1754944e-38, %v414_v60 }
 0x1c5   : > { %vm413_vm1 = vcmp.eq.f32.partialorder %v412_v62, 8.507059e+37 }
 0x1c6   : > { %v335_v35 = vsel %vm334_vm7, %v622_v27, %v331_v33 }
 0x1c7   : > { %v340_v36 = vsel %vm337_vm8, %v339_v34, %v335_v35  ;;  %v628_v48 = vpop.eup %627 }
 0x1c8   : > { %443 = vperm.xlu0 %616, %v340_v36   ;;  %v419_v49 = vmul.f32 %v628_v48, %v402_v45  ;;  %v630_v50 = vpop.eup %629  ;;  %vm424_vm10 = vweird.f32 %v628_v48 }
 0x1c9   : > { %v404_v52 = vmul.f32 %v630_v50, %v401_v47  ;;  %vm425_vm11 = vmor %vm423_vm9, %vm424_vm10  ;;  %vm409_vm13 = vweird.f32 %v630_v50 }
 0x1ca   : > { %v420_v51 = vsub.f32 1.0, %v419_v49  ;;  %vm410_vm15 = vmor %vm408_vm12, %vm409_vm13 }
 0x1cb   : > { %v405_v54 = vsub.f32 1.0, %v404_v52 }
 0x1cc   : > { %v421_v53 = vmul.f32 %v628_v48, %v420_v51 }
 0x1cd   : > { %v406_v56 = vmul.f32 %v630_v50, %v405_v54 }
 0x1ce   : > { %v422_v57 = vadd.f32 %v628_v48, %v421_v53 }
 0x1cf   : > { %v407_v61 = vadd.f32 %v630_v50, %v406_v56 }
 0x1d0   : > { %v426_v63 = vsel %vm425_vm11, %v628_v48, %v422_v57 }
 0x1d1   : > { %v431_v2 = vsel %vm428_vm14, %v430_v59, %v426_v63  ;;  %v411_v3 = vsel %vm410_vm15, %v630_v50, %v407_v61 }
 0x1d2   : > { %v434_v4 = vperm.slane %v431_v2, 0  ;;  %v416_v5 = vsel %vm413_vm1, %v415_v1, %v411_v3 }
 0x1d3   : > { %v433_v8 = vperm.slane %v416_v5, 0 }
 0x1d4   : > { %v437_v9 = vrot.slane %v434_v4, 4 }
 0x1d6   : > { %v438_v11 = vsel %vm251_vm0, %v433_v8, %v437_v9 }
 0x1d7   : > { %v440_v14 = vmul.f32 %v438_v11, %v861_v0 }
 0x23a   : > { %v444_v12 = vpop.permute.xlu0 %443 }
 0x23b   : > { %v448_v13 = vperm.slane %v444_v12, %v447_v10 }
 0x23d   : > { %v450_v15 = vmul.f32 %v448_v13, %v861_v0 }
 0x23f   : > { %v451_v16 = vadd.f32 %v450_v15, %v440_v14 }
 0x241   : > { %452 = vst [vmem:[%s243_s9] sm:$0xff] %v451_v16 }
 0x242   : > { %688 = shalt.err (!%p685_p4)
}
 0x243   : > { %569 = dma.vmem_to_hbm [thread:$0]  (%p815_p11), %s468_s10, 128, %s470_s12, %s454_s4  }
 0x244 PF: > { %s481_s8 = sand.u32 1, %s715_s20   ;;  %p928_p7 = scmp.ge.s32.totalorder %s727_s23, 2 }
 0x245   : > { %s482_s18 = scalar_lea.sflag [#allocation5], %s481_s8 }
 0x246   : > { %p576_p5 = pnand %p928_p7, %p819_p12 }
 0x248   : > { %p577_p8 = pneg %p576_p5 }
 0x24a   : > { %710 = dma.done.wait (%p577_p8), %s482_s18, 128  }
 0x24b   : > { %712 = vsyncadd (%p577_p8), %s482_s18, 4294967168  ;;  %p19_p10 = scmp.ge.s32.totalorder %s790_s25, 4   ;;  %s929_s20 = smov %s719_s21 }
 0x24c   : > { %s930_s21 = smov %s723_s22  ;;  %s931_s22 = smov %s802_s28 }
 0x24d   : > { %s932_s23 = smov %s790_s25  ;;  %21 = sbr.rel (!%p19_p10) target bundleno = 7 (0x7), region = 85 }
 0x252   :  { %488 = vsyncpa [#allocation4], 1 }
 0x253   :  { %490 = vsyncpa [#allocation4 + $0x1], 1 }
 0x254   :  { %491 = vsyncpa [#allocation5], 1 }
 0x255   :  { %493 = vsyncpa [#allocation5 + $0x1], 1 }

</bundles_post_ra>
